<compile_context>
chip_gen: v5e
topology: v5e:2x2
jax: 0.10.0
libtpu: 0.0.40
codegen_flags: <defaults>
</compile_context>

<pallas_src>
from functools import partial

import numpy as np
import jax
import jax.numpy as jnp
from jax.experimental import pallas as pl
from jax.experimental.pallas import tpu as pltpu


def _conv_der_kernel(x_ref, o_ref, *, taps, Ho, Wo):
    """x_ref: (TB, H, W) VMEM block; o_ref: (TB, Ho, Wo) VMEM block.

    W is the lane axis, H the sublane axis, TB a small batch tile.  Each
    nonzero tap is a static window read directly from the ref (no whole-block
    value materialization), accumulated in f32, cast once on store.
    """
    ki0, kj0, c0 = taps[0]
    acc = c0 * x_ref[:, ki0:ki0 + Ho, kj0:kj0 + Wo].astype(jnp.float32)
    for ki, kj, c in taps[1:]:          # statically unrolled; zero taps skipped
        acc = acc + c * x_ref[:, ki:ki + Ho, kj:kj + Wo].astype(jnp.float32)
    o_ref[...] = acc.astype(o_ref.dtype)


def _lax_conv2d_derivative(x, der_filter, resol):
    """Reference/fallback path: identical math via XLA's fused conv."""
    w = jnp.asarray(der_filter, dtype=jnp.float32)
    y = jax.lax.conv_general_dilated(
        x.astype(jnp.float32), w, window_strides=(1, 1), padding="VALID",
        dimension_numbers=("NCHW", "OIHW", "NCHW"))
    return (y / resol).astype(x.dtype)


def _pick_batch_tile(n, plane_bytes, target_bytes=2 << 20):
    """Largest divisor of n with ~target_bytes per block and >= 2 grid steps."""
    max_tb = max(1, min(n, target_bytes // max(plane_bytes, 1)))
    if n >= 2:
        max_tb = min(max_tb, max(1, n // 2))  # keep >= 2 parallel steps (v7x: 2 TCs)
    tb = 1
    for d in range(1, int(max_tb) + 1):
        if n % d == 0:
            tb = d
    return tb


def conv2d_derivative(x, der_filter, resol, *, force_pallas=False):
    """x: (N, 1, H, W); der_filter: (1, 1, kH, kW); returns (N, 1, Ho, Wo)."""
    N, C, H, W = x.shape
    assert C == 1, "Conv2dDerivative uses 1 input / 1 output channel"
    kH, kW = int(der_filter.shape[-2]), int(der_filter.shape[-1])
    Ho, Wo = H - (kH - 1), W - (kW - 1)

    # DerFilter / resol are fixed module constants -> fold 1/resol into the
    # taps and bake them as Python floats.  If they ever arrive as traced
    # values (inside jit/grad), use the XLA conv path instead of silently
    # capturing stale constants.
    try:
        w = np.asarray(jax.device_get(der_filter), dtype=np.float64).reshape(kH, kW)
        inv_resol = 1.0 / float(resol)
    except (TypeError, jax.errors.TracerArrayConversionError,
            jax.errors.ConcretizationTypeError):
        return _lax_conv2d_derivative(x, der_filter, resol)

    taps = tuple((ki, kj, float(w[ki, kj] * inv_resol))
                 for ki in range(kH) for kj in range(kW)
                 if w[ki, kj] != 0.0)
    if not taps:  # all-zero filter -> all-zero derivative
        return jnp.zeros((N, 1, Ho, Wo), dtype=x.dtype)

    itemsize = x.dtype.itemsize
    plane_in_b = H * W * itemsize
    plane_out_b = Ho * Wo * itemsize

    # Generation-aware VMEM budget (v7x: 64 MiB physical, v5e/v6e: 128 MiB),
    # always leaving headroom for compiler-internal scratch.
    try:
        vmem_phys = int(pltpu.get_tpu_info().vmem_capacity_bytes)
    except Exception:
        vmem_phys = 64 << 20  # conservative (v7x) default
    vmem_cap = (vmem_phys * 3) // 4

    # Tiny problems: fixed pallas_call overhead dominates -> XLA conv.
    if not force_pallas and N * plane_in_b < (256 << 10):
        return _lax_conv2d_derivative(x, der_filter, resol)

    # Planes too large for double-buffered whole-plane blocks -> XLA conv.
    # TODO(synk): halo'd H-tiling (manual DMA / pl.Element offsets) for huge planes.
    if 2 * (plane_in_b + plane_out_b) + (4 << 20) > vmem_cap:
        return _lax_conv2d_derivative(x, der_filter, resol)

    TB = _pick_batch_tile(N, plane_in_b)
    in_block_b = TB * plane_in_b
    out_block_b = TB * plane_out_b
    vmem_limit = int(min(max(2 * (in_block_b + out_block_b) + (4 << 20), 16 << 20),
                         vmem_cap))

    kernel = partial(_conv_der_kernel, taps=taps, Ho=Ho, Wo=Wo)

    x3 = x.reshape(N, H, W)  # drop the size-1 channel dim (free, no transpose)
    out = pl.pallas_call(
        kernel,
        out_shape=jax.ShapeDtypeStruct((N, Ho, Wo), x.dtype),
        grid=(N // TB,),
        in_specs=[pl.BlockSpec((TB, H, W), lambda b: (b, 0, 0))],
        out_specs=pl.BlockSpec((TB, Ho, Wo), lambda b: (b, 0, 0)),
        compiler_params=pltpu.CompilerParams(
            dimension_semantics=("parallel",),
            vmem_limit_bytes=vmem_limit),
    )(x3)

    return out.reshape(N, 1, Ho, Wo)


if __name__ == "__main__":
    key = jax.random.PRNGKey(0)
    key_small, key_big = jax.random.split(key)

    # Fixed derivative filter (discrete Laplacian), shape (1, 1, 3, 3),
    # exactly like the DerFilter assigned to nn.Conv2d's weight.
    lapl_filter = jnp.array(
        [[[[0.0, 1.0, 0.0],
           [1.0, -4.0, 1.0],
           [0.0, 1.0, 0.0]]]], dtype=jnp.float32)
    resol = 0.25  # e.g. dx**2

    def ref_conv(x):
        return jax.lax.conv_general_dilated(
            x, lapl_filter, window_strides=(1, 1), padding="VALID",
            dimension_numbers=("NCHW", "OIHW", "NCHW")) / resol

    # Small example consistent with the module: N=2, C=1, 16x16 spatial.
    x = jax.random.normal(key_small, (2, 1, 16, 16), dtype=jnp.float32)
    y = jax.block_until_ready(conv2d_derivative(x, lapl_filter, resol,
                                                force_pallas=True))
    assert y.shape == (2, 1, 14, 14)
    assert jnp.allclose(y, ref_conv(x), atol=1e-5, rtol=1e-5)

    # The non-forced call takes the tiny-problem fallback; must match too.
    y_fb = jax.block_until_ready(conv2d_derivative(x, lapl_filter, resol))
    assert jnp.allclose(y_fb, ref_conv(x), atol=1e-5, rtol=1e-5)

    # Burgers-sized planes (128x128): W fills the 128-lane axis exactly.
    x2 = jax.random.normal(key_big, (4, 1, 128, 128), dtype=jnp.float32)
    y2 = jax.block_until_ready(conv2d_derivative(x2, lapl_filter, resol,
                                                 force_pallas=True))
    assert y2.shape == (4, 1, 126, 126)
    assert jnp.allclose(y2, ref_conv(x2), atol=1e-4, rtol=1e-4)

    print("KERNEL_OK")
</pallas_src>

<mosaic_0001>
module attributes {stable_mosaic.version = 11 : i64} {
  func.func @_conv_der_kernel(%arg0: i32, %arg1: memref<1x16x16xf32, #tpu.memory_space<vmem>>, %arg2: memref<1x14x14xf32, #tpu.memory_space<vmem>>) attributes {dimension_semantics = [#tpu.dimension_semantics<parallel>], iteration_bounds = array<i64: 2>, scalar_prefetch = 0 : i64, scratch_operands = 0 : i64, tpu.core_type = #tpu.core_type<tc>, window_params = [{transform_indices = @transform_0, window_bounds = array<i64: 1, 16, 16>}, {transform_indices = @transform_1, window_bounds = array<i64: 1, 14, 14>}]} {
    %c0 = arith.constant 0 : index
    %c0_0 = arith.constant 0 : index
    %c1 = arith.constant 1 : index
    %0 = vector.load %arg1[%c0, %c0_0, %c1] : memref<1x16x16xf32, #tpu.memory_space<vmem>>, vector<1x14x14xf32>
    %cst = arith.constant 4.000000e+00 : f32
    %1 = vector.broadcast %cst : f32 to vector<1x14x14xf32>
    %2 = arith.mulf %1, %0 : vector<1x14x14xf32>
    %c0_1 = arith.constant 0 : index
    %c1_2 = arith.constant 1 : index
    %c0_3 = arith.constant 0 : index
    %3 = vector.load %arg1[%c0_1, %c1_2, %c0_3] : memref<1x16x16xf32, #tpu.memory_space<vmem>>, vector<1x14x14xf32>
    %cst_4 = arith.constant 4.000000e+00 : f32
    %4 = vector.broadcast %cst_4 : f32 to vector<1x14x14xf32>
    %5 = arith.mulf %4, %3 : vector<1x14x14xf32>
    %6 = arith.addf %2, %5 : vector<1x14x14xf32>
    %c0_5 = arith.constant 0 : index
    %c1_6 = arith.constant 1 : index
    %c1_7 = arith.constant 1 : index
    %7 = vector.load %arg1[%c0_5, %c1_6, %c1_7] : memref<1x16x16xf32, #tpu.memory_space<vmem>>, vector<1x14x14xf32>
    %cst_8 = arith.constant -1.600000e+01 : f32
    %8 = vector.broadcast %cst_8 : f32 to vector<1x14x14xf32>
    %9 = arith.mulf %8, %7 : vector<1x14x14xf32>
    %10 = arith.addf %6, %9 : vector<1x14x14xf32>
    %c0_9 = arith.constant 0 : index
    %c1_10 = arith.constant 1 : index
    %c2 = arith.constant 2 : index
    %11 = vector.load %arg1[%c0_9, %c1_10, %c2] : memref<1x16x16xf32, #tpu.memory_space<vmem>>, vector<1x14x14xf32>
    %cst_11 = arith.constant 4.000000e+00 : f32
    %12 = vector.broadcast %cst_11 : f32 to vector<1x14x14xf32>
    %13 = arith.mulf %12, %11 : vector<1x14x14xf32>
    %14 = arith.addf %10, %13 : vector<1x14x14xf32>
    %c0_12 = arith.constant 0 : index
    %c2_13 = arith.constant 2 : index
    %c1_14 = arith.constant 1 : index
    %15 = vector.load %arg1[%c0_12, %c2_13, %c1_14] : memref<1x16x16xf32, #tpu.memory_space<vmem>>, vector<1x14x14xf32>
    %cst_15 = arith.constant 4.000000e+00 : f32
    %16 = vector.broadcast %cst_15 : f32 to vector<1x14x14xf32>
    %17 = arith.mulf %16, %15 : vector<1x14x14xf32>
    %18 = arith.addf %14, %17 : vector<1x14x14xf32>
    %c0_16 = arith.constant 0 : index
    %c0_17 = arith.constant 0 : index
    %c0_18 = arith.constant 0 : index
    %19 = vector.load %arg2[%c0_16, %c0_17, %c0_18] : memref<1x14x14xf32, #tpu.memory_space<vmem>>, vector<1x14x14xf32>
    tpu.vector_store %arg2[%c0_16, %c0_17, %c0_18], %18 {strides = array<i32>} : memref<1x14x14xf32, #tpu.memory_space<vmem>>, vector<1x14x14xf32>,
    return
  }
  func.func @transform_0(%arg0: i32) -> (i32, i32, i32) {
    %c0_i32 = arith.constant 0 : i32
    %c0_i32_0 = arith.constant 0 : i32
    %c0_i32_1 = arith.constant 0 : i32
    return %arg0, %c0_i32, %c0_i32_0 : i32, i32, i32
  }
  func.func @transform_1(%arg0: i32) -> (i32, i32, i32) {
    %c0_i32 = arith.constant 0 : i32
    %c0_i32_0 = arith.constant 0 : i32
    %c0_i32_1 = arith.constant 0 : i32
    return %arg0, %c0_i32, %c0_i32_0 : i32, i32, i32
  }
}

</mosaic_0001>

<bundles_post_ra>
// kernel: tpu_custom_call.1
= control target key start
LH: loop header
LB: loop body
LE: loop exit
PB: predicated region body
PF: predicated region fallthrough
CT: control target
= control target key end

     0   :  { %6 = vsyncpa [#allocation3], 0  ;;  %s483_s0 = inlined_call_operand.hbm [shape: f32[2,16,16], index: 0, kind: input, shape index: {}]   ;;  %s484_s1 = inlined_call_operand.vmem [shape: f32[2,14,14], index: 1, kind: output, shape index: {}]  }
   0x1   :  { %8 = vsyncpa [#allocation3 + $0x1], 0  ;;  %s391_s6 = smov 0   ;;  %s393_s7 = smov 0  }
   0x2   :  { %s395_s8 = smov 0   ;;  %s397_s9 = smov 0  }
   0x3 LB: > { %s410_s10 = sadd.s32 4294967295, %s375_s9   ;;  %s413_s11 = sadd.s32 1, %s375_s9   ;;  %s375_s9 = sphi %s397_s9, %s491_s9   ;;  %s371_s8 = sphi %s395_s8, %s490_s8   ;;  %s367_s7 = sphi %s393_s7, %s489_s7   ;;  %s363_s6 = sphi %s391_s6, %s488_s6  }
   0x4   : > { %s18_s12 = ssub.s32 %s375_s9, %s413_s11  ;;  %s21_s13 = sadd.s32 1, %s371_s8 }
   0x5   : > { %p19_p0 = scmp.eq.s32.totalorder %s18_s12, 0  ;;  %p28_p1 = scmp.ne.s32.totalorder %s371_s8, %s367_s7 }
   0x6   : > { %p29_p2 = scmp.eq.s32.totalorder %s375_s9, 0  ;;  %p34_p3 = scmp.ne.s32.totalorder %s367_s7, %s363_s6 }
   0x7   : > { %s423_s14 = scalar_select %p19_p0, %s371_s8, %s21_s13  }
   0x8   : > { %p425_p4 = por %p29_p2, %p28_p1  ;;  %p35_p5 = scmp.eq.s32.totalorder %s410_s10, 0 }
   0x9   : > { %p274_p6 = scmp.lt.s32.totalorder %s375_s9, 2  ;;  %s84_s17 = sand.u32 1, %s371_s8  }
   0xa   : > { %p431_p7 = por %p35_p5, %p34_p3  ;;  %s257_s18 = sshll.u32 %s84_s17, 4 }
   0xb   : > { %s266_s19 = sshll.u32 %s375_s9, 4  ;;  %s88_s23 = scalar_lea.vmem [#allocation2], %s257_s18 }
   0xc   : > { %s93_s22 = scalar_lea.hbm %s483_s0, %s266_s19  ;;  %s96_s24 = sshll.u32 %s88_s23, 4  ;;  %s97_s24 = int_to_ptr.vmem [resolvable:$true] %s96_s24 }
   0xd   : > { %s94_s25 = sshll.u32 %s93_s22, 4  ;;  %p442_p8 = pnand %p274_p6, %p425_p4  ;;  %s95_s25 = int_to_ptr.hbm [resolvable:$true] %s94_s25 }
   0xe   : > { %p260_p9 = scmp.ge.s32.totalorder %s375_s9, 1  ;;  %s85_s27 = scalar_lea.sflag [#allocation3], %s84_s17 }
   0xf   : > { %s311_s28 = sshra.s32 %s95_s25, 4  ;;  %p315_p11 = pneg %p442_p8  ;;  %s312_s28 = int_to_ptr.hbm [resolvable:$true] %s311_s28 }
  0x10   : > { %s313_s29 = scalar_lea.hbm %s312_s28, 16  ;;  %s318_s3 = scalar_lea.hbm %s483_s0, 32 }
  0x11   : > { %p314_p10 = scmp.ne.s32.totalorder %s312_s28, %s313_s29  ;;  %p319_p0 = scmp.lt.s32.totalorder %s312_s28, %s483_s0 }
  0x12   : > { %p320_p1 = scmp.lt.s32.totalorder %s318_s3, %s313_s29 }
  0x13   : > { %p316_p12 = pnand %p315_p11, %p314_p10 }
  0x14   : > { %p321_p2 = por %p320_p1, %p319_p0 }
  0x15   : > { %p317_p13 = pneg %p316_p12 }
  0x17   : > { %p322_p3 = pnand %p321_p2, %p317_p13 }
  0x19   : > { %325 = shalt.err (!%p322_p3)
}
  0x1a   : > { %s377_s6 = smov 128   ;;  %s378_s12 = smov 8  }
  0x1b   : > { %273 = dma.hbm_to_vmem [thread:$0]  (!%p442_p8), %s95_s25, 256, %s97_s24, %s85_s27, %s377_s6, %s377_s6, %s378_s12  }
  0x1c   : > { %p104_p4 = scmp.lt.s32.totalorder %s375_s9, 3 }
  0x1e   : > { %p105_p5 = pnand %p260_p9, %p104_p4 }
  0x1f   : > { %s110_s13 = sand.u32 (!%p105_p5), 1, %s367_s7  }
  0x20   : > { %108 = sbr.rel (%p105_p5) target bundleno = 264 (0x108), region = 24  ;;  %s261_s15 = sshll.u32 (!%p105_p5), %s110_s13, 4 }
  0x21   : > { %s111_s17 = scalar_lea.sflag (!%p105_p5), [#allocation3], %s110_s13  ;;  %s114_s18 = scalar_lea.vmem (!%p105_p5), [#allocation2], %s261_s15 }
  0x25   : > { %358 = dma.done.wait (%p431_p7), %s111_s17, 256  }
  0x26   : > { %360 = vsyncadd (%p431_p7), %s111_s17, 4294967040  ;;  %v143_v0 = vld [vmem:[%s114_s18 + $0x1] sm:$0xff]  ;;  %s379_s19 = smov 1   ;;  %s380_s20 = smov 127   ;;  %v144_v2 = vld [vmem:[%s114_s18 + $0x9] sm:$0x3f] }
  0x27   : > { %v145_v1 = vmul.f32 4.0, %v143_v0  ;;  %v146_v3 = vmul.f32 4.0, %v144_v2  ;;  %v139_v4 = vld [vmem:[%s114_s18] sm:$0xff]  ;;  %v157_v6 = vmul.f32 -16.0, %v143_v0  ;;  %v140_v11 = vld [vmem:[%s114_s18 + $0x8] sm:$0x3f] }
  0x28   : > { %v141_v5 = vmul.f32 4.0, %v139_v4  ;;  %v169_v9 = vld [vmem:[%s114_s18 + $0x2] sm:$0xff]  ;;  %v142_v15 = vmul.f32 4.0, %v140_v11  ;;  %v158_v17 = vmul.f32 -16.0, %v144_v2  ;;  %v170_v19 = vld [vmem:[%s114_s18 + $0xa] sm:$0x3f] }
  0x29   : > { %149 = vrot.lane.b32.xlu0 %v145_v1, %s379_s19  ;;  %161 = vrot.lane.b32.xlu1 %v145_v1, %s380_s20  ;;  %v171_v13 = vmul.f32 4.0, %v169_v9  ;;  %v172_v22 = vmul.f32 4.0, %v170_v19  ;;  %p134_p6 = scmp.lt.s32.totalorder %s410_s10, 1  ;;  %vm183_vm0 = vcmask 113664   ;;  %vm185_vm1 = vcmask 111616  }
  0x2b   : > { %s493_s10 = smov (!%p134_p6, %s410_s10), 1 }
  0x2c   : > { %s267_s9 = sshll.u32 %s493_s10, 4 }
  0x2d   : > { %s138_s22 = scalar_lea.vmem %s484_s1, %s267_s9 }
  0x31   : > { %151 = vrot.lane.b32.xlu0 %v146_v3, %s379_s19  ;;  %163 = vrot.lane.b32.xlu1 %v146_v3, %s380_s20 }
  0x9b   : > { %v150_v7 = vpop.permute.xlu0 %149  ;;  %v162_v8 = vpop.permute.xlu1 %161 }
  0x9c   : > { %v155_v10 = vadd.f32 %v150_v7, %v141_v5 }
  0x9e   : > { %v159_v12 = vadd.f32 %v157_v6, %v155_v10 }
  0xa0   : > { %v167_v14 = vadd.f32 %v162_v8, %v159_v12 }
  0xa2   : > { %v173_v16 = vadd.f32 %v171_v13, %v167_v14 }
  0xa3   : > { %v152_v18 = vpop.permute.xlu0 %151  ;;  %v164_v21 = vpop.permute.xlu1 %163 }
  0xa4   : > { %v156_v20 = vadd.f32 %v152_v18, %v142_v15  ;;  %177 = vrot.lane.b32.xlu2 %v173_v16, %s380_s20 }
  0xa6   : > { %v160_v23 = vadd.f32 %v158_v17, %v156_v20 }
  0xa8   : > { %v168_v24 = vadd.f32 %v164_v21, %v160_v23 }
  0xaa   : > { %v174_v25 = vadd.f32 %v172_v22, %v168_v24 }
  0xac   : > { %179 = vrot.lane.b32.xlu2 %v174_v25, %s380_s20 }
  0xfe   : > { %v178_v26 = vpop.permute.xlu2 %177 }
  0xff   : > { %184 = vst.msk [vmem:[%s138_s22] sm:$0xff] %vm183_vm0, %v178_v26 }
 0x106   : > { %v180_v27 = vpop.permute.xlu2 %179 }
 0x107   : > { %186 = vst.msk [vmem:[%s138_s22 + $0x8] sm:$0x3f] %vm185_vm1, %v180_v27 }
 0x108 PF: > { %p11_p7 = scmp.ge.s32.totalorder %s413_s11, 4   ;;  %s488_s6 = smov %s367_s7 }
 0x109   : > { %s489_s7 = smov %s371_s8  ;;  %s490_s8 = smov %s423_s14 }
 0x10a   : > { %s491_s9 = smov %s413_s11  ;;  %13 = sbr.rel (!%p11_p7) target bundleno = 3 (0x3), region = 64 }
 0x10f   :  { %208 = vsyncpa [#allocation3], 1 }
 0x110   :  { %210 = vsyncpa [#allocation3 + $0x1], 1 }

</bundles_post_ra>
